<compile_context>
chip_gen: v7x
topology: tpu7x:2x2x1
jax: 0.10.0
libtpu: 0.0.40
codegen_flags: <defaults>
</compile_context>

<pallas_src>
import jax
import jax.numpy as jnp
from jax.experimental import pallas as pl
from jax.experimental.pallas import tpu as pltpu

_EPS = 1e-5
_H = 32  # hidden width of every layer


def _bn_tanh(h, gamma, beta):
    # BatchNorm1d (training mode) folded into one scale/shift, then tanh.
    # tanh((h - mu) * rsqrt(var + eps) * gamma + beta) == tanh(h * s + t)
    mu = jnp.mean(h, axis=0, keepdims=True)
    var = jnp.mean(jnp.square(h - mu), axis=0, keepdims=True)
    s = gamma * jax.lax.rsqrt(var + _EPS)
    t = beta - mu * s
    return jnp.tanh(h * s + t)


def dqn_kernel(x_ref, u_ref, p_ref, o_ref):
    """One grid step = one independent minibatch (its own BatchNorm statistics).

    x_ref: (B, xdim)   u_ref: (B, udim)
    p_ref: (6, _H, _H) parameter slab:
        plane 0: rows 0..xdim-1 = W1[:xdim]   (rest zero)   -- "W1x"
        plane 1: rows 0..udim-1 = W1[xdim:]   (rest zero)   -- "W1u"
        plane 2: W2      plane 3: W3
        plane 4: column 0 = W4, columns 1.. zero
        plane 5: rows 0..8 = b1,g1,be1,b2,g2,be2,b3,g3,be3 ; row 9 lane 0 = b4
    o_ref: (B, _H) lane-dense output slab; column 0 is the DQN output.
    """
    xdim = x_ref.shape[1]
    udim = u_ref.shape[1]
    vec = p_ref[5]                                    # (_H, _H); rows 0..9 used

    # Layer 1: two sublane-aligned dots instead of a lane-axis [x|u|0] concat.
    h = (jnp.dot(x_ref[...], p_ref[0][:xdim, :], preferred_element_type=jnp.float32)
         + jnp.dot(u_ref[...], p_ref[1][:udim, :], preferred_element_type=jnp.float32)
         + vec[0:1])
    h = _bn_tanh(h, vec[1:2], vec[2:3])

    h = jnp.dot(h, p_ref[2], preferred_element_type=jnp.float32) + vec[3:4]
    h = _bn_tanh(h, vec[4:5], vec[5:6])

    h = jnp.dot(h, p_ref[3], preferred_element_type=jnp.float32) + vec[6:7]
    h = _bn_tanh(h, vec[7:8], vec[8:9])

    h = jnp.dot(h, p_ref[4], preferred_element_type=jnp.float32) + vec[9:10]
    o_ref[...] = jnp.tanh(h)                          # cols 1.._H-1 are tanh(0)=0


@jax.jit
def dqn_forward_batched(xs, us, pslab):
    """xs: (G, B, xdim), us: (G, B, udim), pslab: (6, _H, _H).

    Evaluates G independent minibatches in ONE pallas_call (grid=(G,), parallel
    across TensorCores on v7x).  Each minibatch gets its own BatchNorm statistics,
    exactly as if DQN.forward were called once per minibatch.  Returns (G, B, 1).
    """
    G, B, xdim = xs.shape
    udim = us.shape[2]
    resident = pl.BlockSpec(memory_space=pltpu.MemorySpace.VMEM)  # params stay in VMEM
    out = pl.pallas_call(
        dqn_kernel,
        out_shape=jax.ShapeDtypeStruct((G, B, _H), jnp.float32),
        grid=(G,),
        in_specs=[
            pl.BlockSpec((None, B, xdim), lambda g: (g, 0, 0)),
            pl.BlockSpec((None, B, udim), lambda g: (g, 0, 0)),
            resident,
        ],
        out_specs=pl.BlockSpec((None, B, _H), lambda g: (g, 0, 0)),
        compiler_params=pltpu.CompilerParams(dimension_semantics=("parallel",)),
    )(xs.astype(jnp.float32), us.astype(jnp.float32), pslab)
    return out[..., :1]                                # fuses inside this jit


@jax.jit
def dqn_forward(x, u, pslab):
    """Single minibatch, exactly the PyTorch DQN.forward(x, u) semantics. (B, 1)."""
    return dqn_forward_batched(x[None], u[None], pslab)[0]


def init_dqn_params(key, xdim, udim):
    """PyTorch-default init: Linear W,b ~ U(-1/sqrt(fan_in), +); BN gamma=1, beta=0.
    Weights stored (in_features, out_features)."""
    dims = [(xdim + udim, _H), (_H, _H), (_H, _H), (_H, 1)]
    params = []
    for i, (din, dout) in enumerate(dims):
        key, kw, kb = jax.random.split(key, 3)
        bound = 1.0 / (din ** 0.5)
        w = jax.random.uniform(kw, (din, dout), jnp.float32, -bound, bound)
        b = jax.random.uniform(kb, (dout,), jnp.float32, -bound, bound)
        params.extend([w, b])
        if i < 3:  # BatchNorm1d(32) after each of the first three Linears
            params.extend([jnp.ones((dout,), jnp.float32),
                           jnp.zeros((dout,), jnp.float32)])
    return params


def pack_params(params, xdim, udim):
    """One-time packing of the 14 parameter arrays into a single (6, _H, _H) slab."""
    (w1, b1, g1, be1, w2, b2, g2, be2, w3, b3, g3, be3, w4, b4) = params
    assert xdim <= _H and udim <= _H, "packed W1 planes assume xdim, udim <= 32"
    p = jnp.zeros((6, _H, _H), jnp.float32)
    p = p.at[0, :xdim, :].set(w1[:xdim])       # W1 rows multiplying x
    p = p.at[1, :udim, :].set(w1[xdim:])       # W1 rows multiplying u
    p = p.at[2].set(w2)
    p = p.at[3].set(w3)
    p = p.at[4, :, :1].set(w4)                 # only column 0; rest stays zero
    for r, v in enumerate([b1, g1, be1, b2, g2, be2, b3, g3, be3]):
        p = p.at[5, r, :].set(v)
    p = p.at[5, 9, :1].set(b4)                 # b4 in lane 0 only
    return p


def dqn_reference(x, u, params):
    # Pure-JAX reference with identical (train-mode BN) semantics.
    (w1, b1, g1, be1, w2, b2, g2, be2, w3, b3, g3, be3, w4, b4) = params
    h = jnp.concatenate([x, u], axis=1)
    for w, b, g, be in ((w1, b1, g1, be1), (w2, b2, g2, be2), (w3, b3, g3, be3)):
        h = h @ w + b
        mu = jnp.mean(h, axis=0, keepdims=True)
        var = jnp.mean(jnp.square(h - mu), axis=0, keepdims=True)
        h = jnp.tanh((h - mu) / jnp.sqrt(var + _EPS) * g + be)
    return jnp.tanh(h @ w4 + b4)


if __name__ == "__main__":
    xdim, udim, batch = 12, 4, 8

    key = jax.random.PRNGKey(0)
    kx, ku, kp = jax.random.split(key, 3)
    params = init_dqn_params(kp, xdim, udim)
    pslab = pack_params(params, xdim, udim)    # packed once, reused every forward

    # --- single minibatch: exact PyTorch DQN.forward(x, u) semantics -------------
    x = jax.random.normal(kx, (batch, xdim), jnp.float32)
    u = jax.random.normal(ku, (batch, udim), jnp.float32)
    out = jax.block_until_ready(dqn_forward(x, u, pslab))
    assert out.shape == (batch, 1)
    assert bool(jnp.all(jnp.isfinite(out)))
    ref = dqn_reference(x, u, params)
    err = float(jnp.max(jnp.abs(out - ref)))
    assert err < 1e-3, f"single-batch mismatch vs pure-JAX reference: {err}"

    # --- many independent minibatches amortized over one pallas_call -------------
    G = 4
    kxs, kus = jax.random.split(jax.random.PRNGKey(1))
    xs = jax.random.normal(kxs, (G, batch, xdim), jnp.float32)
    us = jax.random.normal(kus, (G, batch, udim), jnp.float32)
    outs = jax.block_until_ready(dqn_forward_batched(xs, us, pslab))
    assert outs.shape == (G, batch, 1)
    for g in range(G):
        rg = dqn_reference(xs[g], us[g], params)
        eg = float(jnp.max(jnp.abs(outs[g] - rg)))
        assert eg < 1e-3, f"batched group {g} mismatch vs reference: {eg}"

    print("KERNEL_OK")
</pallas_src>

<mosaic_0001>
module attributes {stable_mosaic.version = 11 : i64} {
  func.func @dqn_kernel(%arg0: i32, %arg1: memref<1x8x12xf32, #tpu.memory_space<vmem>>, %arg2: memref<1x8x4xf32, #tpu.memory_space<vmem>>, %arg3: memref<6x32x32xf32, #tpu.memory_space<vmem>>, %arg4: memref<1x8x32xf32, #tpu.memory_space<vmem>>) attributes {dimension_semantics = [#tpu.dimension_semantics<parallel>], iteration_bounds = array<i64: 1>, scalar_prefetch = 0 : i64, scratch_operands = 0 : i64, tpu.core_type = #tpu.core_type<tc>, window_params = [{transform_indices = @transform_0, window_bounds = array<i64: 1, 8, 12>}, {transform_indices = @transform_1, window_bounds = array<i64: 1, 8, 4>}, {pipeline_mode = #tpu.pipeline_mode<synchronous>, transform_indices = @transform_2, window_bounds = array<i64: 6, 32, 32>}, {transform_indices = @transform_3, window_bounds = array<i64: 1, 8, 32>}]} {
    %c5 = arith.constant 5 : index
    %c0 = arith.constant 0 : index
    %c0_0 = arith.constant 0 : index
    %0 = vector.load %arg3[%c5, %c0, %c0_0] : memref<6x32x32xf32, #tpu.memory_space<vmem>>, vector<1x32x32xf32>
    %1 = vector.shape_cast %0 : vector<1x32x32xf32> to vector<32x32xf32>
    %c0_1 = arith.constant 0 : index
    %c0_2 = arith.constant 0 : index
    %c0_3 = arith.constant 0 : index
    %2 = vector.load %arg1[%c0_1, %c0_2, %c0_3] : memref<1x8x12xf32, #tpu.memory_space<vmem>>, vector<1x8x12xf32>
    %3 = vector.shape_cast %2 : vector<1x8x12xf32> to vector<8x12xf32>
    %c0_4 = arith.constant 0 : index
    %c0_5 = arith.constant 0 : index
    %c0_6 = arith.constant 0 : index
    %4 = vector.load %arg3[%c0_4, %c0_5, %c0_6] : memref<6x32x32xf32, #tpu.memory_space<vmem>>, vector<1x32x32xf32>
    %5 = vector.shape_cast %4 : vector<1x32x32xf32> to vector<32x32xf32>
    %6 = vector.extract_strided_slice %5 {offsets = [0, 0], sizes = [12, 32], strides = [1, 1]} : vector<32x32xf32> to vector<12x32xf32>
    %cst = arith.constant dense<0.000000e+00> : vector<8x32xf32>
    %7 = tpu.matmul %3, %6, %cst {dimension_numbers = #tpu.dot_dimension_numbers<[1], [0], [0], [1], [0, 0, 1, 1], [], []>} : vector<8x12xf32>, vector<12x32xf32>, vector<8x32xf32> -> vector<8x32xf32>
    %c0_7 = arith.constant 0 : index
    %c0_8 = arith.constant 0 : index
    %c0_9 = arith.constant 0 : index
    %8 = vector.load %arg2[%c0_7, %c0_8, %c0_9] : memref<1x8x4xf32, #tpu.memory_space<vmem>>, vector<1x8x4xf32>
    %9 = vector.shape_cast %8 : vector<1x8x4xf32> to vector<8x4xf32>
    %c1 = arith.constant 1 : index
    %c0_10 = arith.constant 0 : index
    %c0_11 = arith.constant 0 : index
    %10 = vector.load %arg3[%c1, %c0_10, %c0_11] : memref<6x32x32xf32, #tpu.memory_space<vmem>>, vector<1x32x32xf32>
    %11 = vector.shape_cast %10 : vector<1x32x32xf32> to vector<32x32xf32>
    %12 = vector.extract_strided_slice %11 {offsets = [0, 0], sizes = [4, 32], strides = [1, 1]} : vector<32x32xf32> to vector<4x32xf32>
    %cst_12 = arith.constant dense<0.000000e+00> : vector<8x32xf32>
    %13 = tpu.matmul %9, %12, %cst_12 {dimension_numbers = #tpu.dot_dimension_numbers<[1], [0], [0], [1], [0, 0, 1, 1], [], []>} : vector<8x4xf32>, vector<4x32xf32>, vector<8x32xf32> -> vector<8x32xf32>
    %14 = arith.addf %7, %13 : vector<8x32xf32>
    %15 = vector.extract_strided_slice %1 {offsets = [0, 0], sizes = [1, 32], strides = [1, 1]} : vector<32x32xf32> to vector<1x32xf32>
    %16 = vector.broadcast %15 : vector<1x32xf32> to vector<8x32xf32>
    %17 = arith.addf %14, %16 : vector<8x32xf32>
    %18 = vector.extract_strided_slice %1 {offsets = [1, 0], sizes = [1, 32], strides = [1, 1]} : vector<32x32xf32> to vector<1x32xf32>
    %19 = vector.extract_strided_slice %1 {offsets = [2, 0], sizes = [1, 32], strides = [1, 1]} : vector<32x32xf32> to vector<1x32xf32>
    %cst_13 = arith.constant dense<0.000000e+00> : vector<32xf32>
    %20 = vector.multi_reduction <add>, %17, %cst_13 [0] : vector<8x32xf32> to vector<32xf32>
    %21 = vector.shape_cast %20 : vector<32xf32> to vector<1x32xf32>
    %cst_14 = arith.constant 8.000000e+00 : f32
    %22 = vector.broadcast %cst_14 : f32 to vector<1x32xf32>
    %23 = arith.divf %21, %22 : vector<1x32xf32>
    %24 = vector.broadcast %23 : vector<1x32xf32> to vector<8x32xf32>
    %25 = arith.subf %17, %24 : vector<8x32xf32>
    %26 = arith.mulf %25, %25 : vector<8x32xf32>
    %cst_15 = arith.constant dense<0.000000e+00> : vector<32xf32>
    %27 = vector.multi_reduction <add>, %26, %cst_15 [0] : vector<8x32xf32> to vector<32xf32>
    %28 = vector.shape_cast %27 : vector<32xf32> to vector<1x32xf32>
    %cst_16 = arith.constant 8.000000e+00 : f32
    %29 = vector.broadcast %cst_16 : f32 to vector<1x32xf32>
    %30 = arith.divf %28, %29 : vector<1x32xf32>
    %cst_17 = arith.constant 9.99999974E-6 : f32
    %31 = vector.broadcast %cst_17 : f32 to vector<1x32xf32>
    %32 = arith.addf %30, %31 : vector<1x32xf32>
    %33 = math.rsqrt %32 : vector<1x32xf32>
    %34 = arith.mulf %18, %33 : vector<1x32xf32>
    %35 = arith.mulf %23, %34 : vector<1x32xf32>
    %36 = arith.subf %19, %35 : vector<1x32xf32>
    %37 = vector.broadcast %34 : vector<1x32xf32> to vector<8x32xf32>
    %38 = arith.mulf %17, %37 : vector<8x32xf32>
    %39 = vector.broadcast %36 : vector<1x32xf32> to vector<8x32xf32>
    %40 = arith.addf %38, %39 : vector<8x32xf32>
    %41 = math.tanh %40 : vector<8x32xf32>
    %c2 = arith.constant 2 : index
    %c0_18 = arith.constant 0 : index
    %c0_19 = arith.constant 0 : index
    %42 = vector.load %arg3[%c2, %c0_18, %c0_19] : memref<6x32x32xf32, #tpu.memory_space<vmem>>, vector<1x32x32xf32>
    %43 = vector.shape_cast %42 : vector<1x32x32xf32> to vector<32x32xf32>
    %cst_20 = arith.constant dense<0.000000e+00> : vector<8x32xf32>
    %44 = tpu.matmul %41, %43, %cst_20 {dimension_numbers = #tpu.dot_dimension_numbers<[1], [0], [0], [1], [0, 0, 1, 1], [], []>} : vector<8x32xf32>, vector<32x32xf32>, vector<8x32xf32> -> vector<8x32xf32>
    %45 = vector.extract_strided_slice %1 {offsets = [3, 0], sizes = [1, 32], strides = [1, 1]} : vector<32x32xf32> to vector<1x32xf32>
    %46 = vector.broadcast %45 : vector<1x32xf32> to vector<8x32xf32>
    %47 = arith.addf %44, %46 : vector<8x32xf32>
    %48 = vector.extract_strided_slice %1 {offsets = [4, 0], sizes = [1, 32], strides = [1, 1]} : vector<32x32xf32> to vector<1x32xf32>
    %49 = vector.extract_strided_slice %1 {offsets = [5, 0], sizes = [1, 32], strides = [1, 1]} : vector<32x32xf32> to vector<1x32xf32>
    %cst_21 = arith.constant dense<0.000000e+00> : vector<32xf32>
    %50 = vector.multi_reduction <add>, %47, %cst_21 [0] : vector<8x32xf32> to vector<32xf32>
    %51 = vector.shape_cast %50 : vector<32xf32> to vector<1x32xf32>
    %cst_22 = arith.constant 8.000000e+00 : f32
    %52 = vector.broadcast %cst_22 : f32 to vector<1x32xf32>
    %53 = arith.divf %51, %52 : vector<1x32xf32>
    %54 = vector.broadcast %53 : vector<1x32xf32> to vector<8x32xf32>
    %55 = arith.subf %47, %54 : vector<8x32xf32>
    %56 = arith.mulf %55, %55 : vector<8x32xf32>
    %cst_23 = arith.constant dense<0.000000e+00> : vector<32xf32>
    %57 = vector.multi_reduction <add>, %56, %cst_23 [0] : vector<8x32xf32> to vector<32xf32>
    %58 = vector.shape_cast %57 : vector<32xf32> to vector<1x32xf32>
    %cst_24 = arith.constant 8.000000e+00 : f32
    %59 = vector.broadcast %cst_24 : f32 to vector<1x32xf32>
    %60 = arith.divf %58, %59 : vector<1x32xf32>
    %cst_25 = arith.constant 9.99999974E-6 : f32
    %61 = vector.broadcast %cst_25 : f32 to vector<1x32xf32>
    %62 = arith.addf %60, %61 : vector<1x32xf32>
    %63 = math.rsqrt %62 : vector<1x32xf32>
    %64 = arith.mulf %48, %63 : vector<1x32xf32>
    %65 = arith.mulf %53, %64 : vector<1x32xf32>
    %66 = arith.subf %49, %65 : vector<1x32xf32>
    %67 = vector.broadcast %64 : vector<1x32xf32> to vector<8x32xf32>
    %68 = arith.mulf %47, %67 : vector<8x32xf32>
    %69 = vector.broadcast %66 : vector<1x32xf32> to vector<8x32xf32>
    %70 = arith.addf %68, %69 : vector<8x32xf32>
    %71 = math.tanh %70 : vector<8x32xf32>
    %c3 = arith.constant 3 : index
    %c0_26 = arith.constant 0 : index
    %c0_27 = arith.constant 0 : index
    %72 = vector.load %arg3[%c3, %c0_26, %c0_27] : memref<6x32x32xf32, #tpu.memory_space<vmem>>, vector<1x32x32xf32>
    %73 = vector.shape_cast %72 : vector<1x32x32xf32> to vector<32x32xf32>
    %cst_28 = arith.constant dense<0.000000e+00> : vector<8x32xf32>
    %74 = tpu.matmul %71, %73, %cst_28 {dimension_numbers = #tpu.dot_dimension_numbers<[1], [0], [0], [1], [0, 0, 1, 1], [], []>} : vector<8x32xf32>, vector<32x32xf32>, vector<8x32xf32> -> vector<8x32xf32>
    %75 = vector.extract_strided_slice %1 {offsets = [6, 0], sizes = [1, 32], strides = [1, 1]} : vector<32x32xf32> to vector<1x32xf32>
    %76 = vector.broadcast %75 : vector<1x32xf32> to vector<8x32xf32>
    %77 = arith.addf %74, %76 : vector<8x32xf32>
    %78 = vector.extract_strided_slice %1 {offsets = [7, 0], sizes = [1, 32], strides = [1, 1]} : vector<32x32xf32> to vector<1x32xf32>
    %79 = vector.extract_strided_slice %1 {offsets = [8, 0], sizes = [1, 32], strides = [1, 1]} : vector<32x32xf32> to vector<1x32xf32>
    %cst_29 = arith.constant dense<0.000000e+00> : vector<32xf32>
    %80 = vector.multi_reduction <add>, %77, %cst_29 [0] : vector<8x32xf32> to vector<32xf32>
    %81 = vector.shape_cast %80 : vector<32xf32> to vector<1x32xf32>
    %cst_30 = arith.constant 8.000000e+00 : f32
    %82 = vector.broadcast %cst_30 : f32 to vector<1x32xf32>
    %83 = arith.divf %81, %82 : vector<1x32xf32>
    %84 = vector.broadcast %83 : vector<1x32xf32> to vector<8x32xf32>
    %85 = arith.subf %77, %84 : vector<8x32xf32>
    %86 = arith.mulf %85, %85 : vector<8x32xf32>
    %cst_31 = arith.constant dense<0.000000e+00> : vector<32xf32>
    %87 = vector.multi_reduction <add>, %86, %cst_31 [0] : vector<8x32xf32> to vector<32xf32>
    %88 = vector.shape_cast %87 : vector<32xf32> to vector<1x32xf32>
    %cst_32 = arith.constant 8.000000e+00 : f32
    %89 = vector.broadcast %cst_32 : f32 to vector<1x32xf32>
    %90 = arith.divf %88, %89 : vector<1x32xf32>
    %cst_33 = arith.constant 9.99999974E-6 : f32
    %91 = vector.broadcast %cst_33 : f32 to vector<1x32xf32>
    %92 = arith.addf %90, %91 : vector<1x32xf32>
    %93 = math.rsqrt %92 : vector<1x32xf32>
    %94 = arith.mulf %78, %93 : vector<1x32xf32>
    %95 = arith.mulf %83, %94 : vector<1x32xf32>
    %96 = arith.subf %79, %95 : vector<1x32xf32>
    %97 = vector.broadcast %94 : vector<1x32xf32> to vector<8x32xf32>
    %98 = arith.mulf %77, %97 : vector<8x32xf32>
    %99 = vector.broadcast %96 : vector<1x32xf32> to vector<8x32xf32>
    %100 = arith.addf %98, %99 : vector<8x32xf32>
    %101 = math.tanh %100 : vector<8x32xf32>
    %c4 = arith.constant 4 : index
    %c0_34 = arith.constant 0 : index
    %c0_35 = arith.constant 0 : index
    %102 = vector.load %arg3[%c4, %c0_34, %c0_35] : memref<6x32x32xf32, #tpu.memory_space<vmem>>, vector<1x32x32xf32>
    %103 = vector.shape_cast %102 : vector<1x32x32xf32> to vector<32x32xf32>
    %cst_36 = arith.constant dense<0.000000e+00> : vector<8x32xf32>
    %104 = tpu.matmul %101, %103, %cst_36 {dimension_numbers = #tpu.dot_dimension_numbers<[1], [0], [0], [1], [0, 0, 1, 1], [], []>} : vector<8x32xf32>, vector<32x32xf32>, vector<8x32xf32> -> vector<8x32xf32>
    %105 = vector.extract_strided_slice %1 {offsets = [9, 0], sizes = [1, 32], strides = [1, 1]} : vector<32x32xf32> to vector<1x32xf32>
    %106 = vector.broadcast %105 : vector<1x32xf32> to vector<8x32xf32>
    %107 = arith.addf %104, %106 : vector<8x32xf32>
    %108 = math.tanh %107 : vector<8x32xf32>
    %c0_37 = arith.constant 0 : index
    %c0_38 = arith.constant 0 : index
    %c0_39 = arith.constant 0 : index
    %109 = vector.load %arg4[%c0_37, %c0_38, %c0_39] : memref<1x8x32xf32, #tpu.memory_space<vmem>>, vector<1x8x32xf32>
    %110 = vector.shape_cast %109 : vector<1x8x32xf32> to vector<8x32xf32>
    %111 = vector.shape_cast %108 : vector<8x32xf32> to vector<1x8x32xf32>
    tpu.vector_store %arg4[%c0_37, %c0_38, %c0_39], %111 {strides = array<i32>} : memref<1x8x32xf32, #tpu.memory_space<vmem>>, vector<1x8x32xf32>,
    return
  }
  func.func @transform_0(%arg0: i32) -> (i32, i32, i32) {
    %c0_i32 = arith.constant 0 : i32
    %c0_i32_0 = arith.constant 0 : i32
    %c0_i32_1 = arith.constant 0 : i32
    return %arg0, %c0_i32, %c0_i32_0 : i32, i32, i32
  }
  func.func @transform_1(%arg0: i32) -> (i32, i32, i32) {
    %c0_i32 = arith.constant 0 : i32
    %c0_i32_0 = arith.constant 0 : i32
    %c0_i32_1 = arith.constant 0 : i32
    return %arg0, %c0_i32, %c0_i32_0 : i32, i32, i32
  }
  func.func @transform_2(%arg0: i32) -> (i32, i32, i32) {
    %c0_i32 = arith.constant 0 : i32
    %c0_i32_0 = arith.constant 0 : i32
    %c0_i32_1 = arith.constant 0 : i32
    %c0_i32_2 = arith.constant 0 : i32
    return %c0_i32, %c0_i32_0, %c0_i32_1 : i32, i32, i32
  }
  func.func @transform_3(%arg0: i32) -> (i32, i32, i32) {
    %c0_i32 = arith.constant 0 : i32
    %c0_i32_0 = arith.constant 0 : i32
    %c0_i32_1 = arith.constant 0 : i32
    return %arg0, %c0_i32, %c0_i32_0 : i32, i32, i32
  }
}

</mosaic_0001>

<bundles_post_ra>
// kernel: dqn_forward_batched.1
= control target key start
LH: loop header
LB: loop body
LE: loop exit
PB: predicated region body
PF: predicated region fallthrough
CT: control target
= control target key end

     0   :  { %8 = vsyncpa [#allocation3], 0  ;;  %s702_s12 = smov [#allocation2]   ;;  %s806_s0 = inlined_call_operand.vmem [shape: f32[1,8,12], index: 0, kind: input, shape index: {}]   ;;  %s807_s1 = inlined_call_operand.vmem [shape: f32[1,8,4], index: 1, kind: input, shape index: {}]   ;;  %s808_s2 = inlined_call_operand.hbm [shape: f32[6,32,32], index: 2, kind: input, shape index: {}]   ;;  %s809_s3 = inlined_call_operand.vmem [shape: f32[1,8,32], index: 3, kind: output, shape index: {}]  }
   0x1   :  { %s18_s13 = sshll.u32 %s702_s12, 4  ;;  %s678_s16 = scalar_lea.hbm %s808_s2, 3072  ;;  %s19_s13 = int_to_ptr.vmem [resolvable:$true] %s18_s13 }
   0x2   :  { %p679_p0 = scmp.ne.s32.totalorder %s808_s2, %s678_s16  ;;  %p682_p1 = scmp.lt.u32.totalorder %s678_s16, %s808_s2 }
   0x4   :  { %p684_p2 = pnand %p682_p1, %p679_p0 }
   0x6   :  { %687 = shalt.err (!%p684_p2)
}
   0x7   :  { %s688_s21 = scalar_lea.vmem %s19_s13, 3072  ;;  %p693_p4 = scmp.lt.s32.totalorder %s19_s13, %s19_s13 }
   0x8   :  { %p689_p3 = scmp.ne.s32.totalorder %s19_s13, %s688_s21  ;;  %p694_p5 = scmp.lt.s32.totalorder %s688_s21, %s688_s21 }
   0xa   :  { %p695_p6 = por %p694_p5, %p693_p4 }
   0xc   :  { %p696_p7 = pnand %p695_p6, %p689_p3 }
   0xe   :  { %699 = shalt.err (!%p696_p7)
}
   0xf   :  { %s703_s22 = smov 128   ;;  %s704_s23 = smov 8  }
  0x10   :  { %24 = dma.hbm_to_vmem [thread:$0]  %s808_s2, 3072, %s19_s13, [#allocation3], %s703_s22, %s703_s22, %s704_s23  }
  0x11   :  { %700 = dma.done.wait [#allocation3], 3072  }
  0x12   :  { %701 = vsyncadd [#allocation3], 4294964224  ;;  %v705_v0 = vmov 0.0   ;;  %vm706_vm0 = vmmov 0   ;;  %v707_v1 = vmov 0.0|0.0   ;;  %vm41_vm1 = vcmask 1043456  }
  0x13   :  { %590 = vmatprep.subr.mxu1 %v705_v0  ;;  %592 = vmatprep.mubr.msk.f32.mxu1 %vm706_vm0, %v705_v0  ;;  %vm37_vm2 = vcmask 31744   ;;  %v36_v2 = vld [vmem:[#allocation2 + $0x20] sm:$0xff]  ;;  %vm708_vm3 = vmmov 1   ;;  %v33_v5 = vld [vmem:[#allocation2 + $0x8] sm:$0xff]  ;;  %vm115_vm5 = vcmask 97280   ;;  %v239_v10 = vld [vmem:[#allocation2 + $0x50] sm:$0xff]  ;;  %v192_v14 = vlaneseq }
  0x14   :  { %639 = vmatprep.subr.bf16.mxu0 %v707_v1  ;;  %610 = vmatprep.mubr.msk.f32.mxu0 %vm706_vm0, %v705_v0  ;;  %v34_v3 = vld [vmem:[%s807_s1] sm:$0xff]  ;;  %vm637_vm4 = vmpackc.low %vm41_vm1, %vm708_vm3  ;;  %v238_v9 = vld [vmem:[#allocation2 + $0x48] sm:$0xff]  ;;  %vm197_vm6 = vcmask 261120  }
  0x15   :  { %v32_v4 = vld [vmem:[#allocation2] sm:$0xff]  ;;  %591 = vmatpush3.msk.msra.mxu1 %vm41_vm1, %v36_v2  ;;  %v240_v12 = vld [vmem:[#allocation2 + $0x58] sm:$0xff]  ;;  %v761_v15 = vshrl.u32 %v192_v14, 7  ;;  %v357_v57 = vld [vmem:[#allocation2 + $0x68] sm:$0xff] }
  0x16   :  { %593 = vmatmul.mubr.msk.f32.vlgmr.msra.gmra.mrb[0].mxu1 %vm37_vm2, %v34_v3  ;;  %635 = vmatprep.subr.bf16.mxu1 %v707_v1  ;;  %v636_v6 = vpack.c.bf16 %v33_v5, %v32_v4  ;;  %v31_v7 = vld [vmem:[%s806_s0] sm:$0xff]  ;;  %v643_v13 = vpack.c.bf16 %v240_v12, %v239_v10  ;;  %v358_v58 = vld [vmem:[#allocation2 + $0x70] sm:$0xff]  ;;  %v359_v60 = vld [vmem:[#allocation2 + $0x78] sm:$0xff] }
  0x17   :  { %599 = vmatprep.mubr.msk.f32.mxu1 %vm706_vm0, %v705_v0  ;;  %v237_v8 = vld [vmem:[#allocation2 + $0x40] sm:$0xff]  ;;  %v194_v17 = vsub.s32 0, %v761_v15  ;;  %v227_v46 = vsub.s32 1, %v761_v15  ;;  %v232_v50 = vsub.s32 2, %v761_v15  ;;  %v649_v61 = vpack.c.bf16 %v359_v60, %v358_v58 }
  0x18   :  { %638 = vmatpush3.bf16.msk.msra.mxu1 %vm637_vm4, %v636_v6  ;;  %v640_v11 = vpack.c.bf16 %v238_v9, %v237_v8  ;;  %v764_v19 = vld [vmem:[#allocation2 + $0xa0] sm:$0xff]  ;;  %v243_v62 = vsub.s32 3, %v761_v15 }
  0x19   :  { %645 = vmatprep.subr.bf16.mxu1 %v707_v1  ;;  %v195_v20 = vrot.slane %v764_v19, %v194_v17  ;;  %v356_v56 = vld [vmem:[#allocation2 + $0x60] sm:$0xff] }
  0x1a   :  { %641 = vmatpush3.bf16.msra.mxu0 %v640_v11  ;;  %v646_v59 = vpack.c.bf16 %v357_v57, %v356_v56  ;;  %v244_v63 = vrot.slane %v764_v19, %v243_v62 }
  0x1b   :  { %600 = vmatmul.mubr.msk.f32.vlgmr.msra.gmra.mrb[2].mxu1 %vm115_vm5, %v31_v7  ;;  %642 = vmatprep.subr.bf16.mxu0 %v707_v1 }
  0x1c   :  { %621 = vmatprep.mubr.msk.f32.mxu1 %vm706_vm0, %v705_v0  ;;  %647 = vmatpush3.bf16.msra.mxu1 %v646_v59 }
  0x1d   :  { %648 = vmatprep.subr.bf16.mxu1 %v707_v1 }
  0x1e   :  { %644 = vmatpush3.bf16.msra.mxu0 %v643_v13 }
  0x1f   :  { %651 = vmatprep.subr.bf16.mxu0 %v707_v1 }
  0x20   :  { %650 = vmatpush3.bf16.msra.mxu1 %v649_v61 }
  0xe9   :  { %v111_v16 = vpop.f32.mrb[0].mxu1 }
  0xea   :  { %v594_v18 = vpop.f32.mrb[1].mxu1 }
  0xee   :  { %v188_v21 = vpop.f32.mrb[2].mxu1 }
  0xef   :  { %v189_v22 = vadd.f32 %v188_v21, %v111_v16  ;;  %v601_v23 = vpop.f32.mrb[3].mxu1 }
  0xf1   :  { %v196_v24 = vadd.f32 %v195_v20, %v189_v22 }
  0xf3   :  { %v198_v25 = vsel %vm197_vm6, %v196_v24, 0.0 }
  0xf4   :  { %v199_v26 = vrot.slane %v198_v25, 4 }
  0xf6   :  { %v200_v27 = vadd.f32 %v199_v26, %v198_v25 }
  0xf8   :  { %v201_v28 = vrot.slane %v200_v27, 2 }
  0xfa   :  { %v202_v29 = vadd.f32 %v201_v28, %v200_v27  ;;  %v346_v28 = vsub.s32 4, %v761_v15 }
  0xfc   :  { %v203_v30 = vrot.slane %v202_v29, 1 }
  0xfe   :  { %v204_v31 = vadd.f32 %v203_v30, %v202_v29 }
 0x100   :  { %v206_v32 = vmul.f32 0.125, %v204_v31 }
 0x102   :  { %v207_v33 = vsub.f32 %v196_v24, %v206_v32 }
 0x104   :  { %v208_v34 = vmul.f32 %v207_v33, %v207_v33 }
 0x106   :  { %v209_v35 = vsel %vm197_vm6, %v208_v34, 0.0 }
 0x107   :  { %v210_v36 = vrot.slane %v209_v35, 4 }
 0x109   :  { %v211_v37 = vadd.f32 %v210_v36, %v209_v35 }
 0x10b   :  { %v212_v38 = vrot.slane %v211_v37, 2 }
 0x10d   :  { %v213_v39 = vadd.f32 %v212_v38, %v211_v37  ;;  %v475_v38 = vld [vmem:[#allocation2 + $0x80] sm:$0xff] }
 0x10f   :  { %v214_v40 = vrot.slane %v213_v39, 1 }
 0x111   :  { %v215_v41 = vadd.f32 %v214_v40, %v213_v39  ;;  %v476_v39 = vld [vmem:[#allocation2 + $0x88] sm:$0xff]  ;;  %v477_v40 = vld [vmem:[#allocation2 + $0x90] sm:$0xff] }
 0x113   :  { %v216_v42 = vmul.f32 0.125, %v215_v41  ;;  %v652_v41 = vpack.c.bf16 %v476_v39, %v475_v38 }
 0x115   :  { %v217_v43 = vadd.f32 1e-05, %v216_v42  ;;  %v478_v42 = vld [vmem:[#allocation2 + $0x98] sm:$0xff] }
 0x117   :  { %664 = vrsqrt.f32 %v217_v43  ;;  %v655_v43 = vpack.c.bf16 %v478_v42, %v477_v40 }
 0x121   :  { %v665_v44 = vpop.eup %664 }
 0x122   :  { %v219_v45 = vmul.f32 %v665_v44, %v764_v19  ;;  %v362_v44 = vsub.s32 6, %v761_v15 }
 0x124   :  { %v220_v47 = vmul.f32 %v219_v45, %v206_v32  ;;  %v228_v49 = vrot.slane %v219_v45, %v227_v46  ;;  %v351_v32 = vsub.s32 5, %v761_v15  ;;  %v363_v45 = vrot.slane %v764_v19, %v362_v44 }
 0x126   :  { %v222_v48 = vrot.slane %v220_v47, 7  ;;  %v229_v52 = vmul.f32 %v228_v49, %v196_v24 }
 0x128   :  { %v224_v51 = vsub.f32 %v764_v19, %v222_v48 }
 0x12a   :  { %v233_v53 = vrot.slane %v224_v51, %v232_v50 }
 0x12c   :  { %v234_v54 = vadd.f32 %v233_v53, %v229_v52 }
 0x12e   :  { %666 = vtanh.f32 %v234_v54 }
 0x138   :  { %v667_v55 = vpop.eup %666 }
 0x139   :  { %611 = vmatmul.mubr.msk.f32.vlgmr.msra.gmra.mrb[0].mxu0 %vm197_vm6, %v667_v55 }
 0x13a   :  { %632 = vmatprep.mubr.msk.f32.mxu0 %vm706_vm0, %v705_v0  ;;  %653 = vmatpush3.bf16.msra.mxu0 %v652_v41 }
 0x13b   :  { %654 = vmatprep.subr.bf16.mxu0 %v707_v1 }
 0x13e   :  { %656 = vmatpush3.bf16.msra.mxu0 %v655_v43 }
 0x20c   :  { %v314_v2 = vpop.f32.mrb[0].mxu0 }
 0x20d   :  { %v315_v3 = vadd.f32 %v314_v2, %v244_v63  ;;  %v612_v4 = vpop.f32.mrb[1].mxu0 }
 0x20f   :  { %v318_v5 = vsel %vm197_vm6, %v315_v3, 0.0 }
 0x210   :  { %v319_v0 = vrot.slane %v318_v5, 4 }
 0x212   :  { %v320_v6 = vadd.f32 %v319_v0, %v318_v5 }
 0x214   :  { %v321_v7 = vrot.slane %v320_v6, 2 }
 0x216   :  { %v322_v8 = vadd.f32 %v321_v7, %v320_v6  ;;  %v465_v7 = vsub.s32 7, %v761_v15 }
 0x218   :  { %v323_v9 = vrot.slane %v322_v8, 1 }
 0x21a   :  { %v324_v10 = vadd.f32 %v323_v9, %v322_v8  ;;  %v30_v9 = vld [vmem:[#allocation2 + $0xa8] sm:$0xff] }
 0x21c   :  { %v325_v11 = vmul.f32 0.125, %v324_v10 }
 0x21e   :  { %v326_v12 = vsub.f32 %v315_v3, %v325_v11 }
 0x220   :  { %v327_v13 = vmul.f32 %v326_v12, %v326_v12 }
 0x222   :  { %v328_v14 = vsel %vm197_vm6, %v327_v13, 0.0 }
 0x223   :  { %v329_v16 = vrot.slane %v328_v14, 4 }
 0x225   :  { %v330_v18 = vadd.f32 %v329_v16, %v328_v14 }
 0x227   :  { %v331_v20 = vrot.slane %v330_v18, 2 }
 0x229   :  { %v332_v21 = vadd.f32 %v331_v20, %v330_v18  ;;  %v482_v20 = vrot.slane %v30_v9, %v227_v46 }
 0x22b   :  { %v333_v22 = vrot.slane %v332_v21, 1 }
 0x22d   :  { %v334_v23 = vadd.f32 %v333_v22, %v332_v21 }
 0x22f   :  { %v335_v24 = vmul.f32 0.125, %v334_v23 }
 0x231   :  { %v336_v25 = vadd.f32 1e-05, %v335_v24 }
 0x233   :  { %668 = vrsqrt.f32 %v336_v25 }
 0x23d   :  { %v669_v26 = vpop.eup %668 }
 0x23e   :  { %v338_v27 = vmul.f32 %v669_v26, %v764_v19 }
 0x240   :  { %v339_v29 = vmul.f32 %v338_v27, %v325_v11  ;;  %v347_v31 = vrot.slane %v338_v27, %v346_v28 }
 0x242   :  { %v341_v30 = vrot.slane %v339_v29, 7  ;;  %v348_v34 = vmul.f32 %v347_v31, %v315_v3 }
 0x244   :  { %v343_v33 = vsub.f32 %v764_v19, %v341_v30 }
 0x246   :  { %v352_v35 = vrot.slane %v343_v33, %v351_v32 }
 0x248   :  { %v353_v36 = vadd.f32 %v352_v35, %v348_v34 }
 0x24a   :  { %670 = vtanh.f32 %v353_v36 }
 0x254   :  { %v671_v37 = vpop.eup %670 }
 0x255   :  { %622 = vmatmul.mubr.msk.f32.vlgmr.msra.gmra.mrb[4].mxu1 %vm197_vm6, %v671_v37 }
 0x328   :  { %v433_v47 = vpop.f32.mrb[4].mxu1 }
 0x329   :  { %v434_v48 = vadd.f32 %v433_v47, %v363_v45  ;;  %v623_v49 = vpop.f32.mrb[5].mxu1 }
 0x32b   :  { %v437_v50 = vsel %vm197_vm6, %v434_v48, 0.0 }
 0x32c   :  { %v438_v51 = vrot.slane %v437_v50, 4 }
 0x32e   :  { %v439_v52 = vadd.f32 %v438_v51, %v437_v50 }
 0x330   :  { %v440_v53 = vrot.slane %v439_v52, 2 }
 0x332   :  { %v441_v54 = vadd.f32 %v440_v53, %v439_v52 }
 0x334   :  { %v442_v55 = vrot.slane %v441_v54, 1 }
 0x336   :  { %v443_v56 = vadd.f32 %v442_v55, %v441_v54 }
 0x338   :  { %v444_v57 = vmul.f32 0.125, %v443_v56 }
 0x33a   :  { %v445_v58 = vsub.f32 %v434_v48, %v444_v57 }
 0x33c   :  { %v446_v59 = vmul.f32 %v445_v58, %v445_v58 }
 0x33e   :  { %v447_v1 = vsel %vm197_vm6, %v446_v59, 0.0 }
 0x33f   :  { %v448_v60 = vrot.slane %v447_v1, 4 }
 0x341   :  { %v449_v61 = vadd.f32 %v448_v60, %v447_v1 }
 0x343   :  { %v450_v62 = vrot.slane %v449_v61, 2 }
 0x345   :  { %v451_v63 = vadd.f32 %v450_v62, %v449_v61 }
 0x347   :  { %v452_v2 = vrot.slane %v451_v63, 1 }
 0x349   :  { %v453_v3 = vadd.f32 %v452_v2, %v451_v63 }
 0x34b   :  { %v454_v4 = vmul.f32 0.125, %v453_v3 }
 0x34d   :  { %v455_v5 = vadd.f32 1e-05, %v454_v4 }
 0x34f   :  { %672 = vrsqrt.f32 %v455_v5 }
 0x359   :  { %v673_v0 = vpop.eup %672 }
 0x35a   :  { %v457_v6 = vmul.f32 %v673_v0, %v764_v19 }
 0x35c   :  { %v458_v8 = vmul.f32 %v457_v6, %v444_v57  ;;  %v466_v11 = vrot.slane %v457_v6, %v465_v7 }
 0x35e   :  { %v460_v10 = vrot.slane %v458_v8, 7  ;;  %v467_v13 = vmul.f32 %v466_v11, %v434_v48 }
 0x360   :  { %v462_v12 = vsub.f32 %v30_v9, %v460_v10 }
 0x362   :  { %v471_v14 = vrot.slane %v462_v12, %v194_v17 }
 0x364   :  { %v472_v16 = vadd.f32 %v471_v14, %v467_v13 }
 0x366   :  { %674 = vtanh.f32 %v472_v16 }
 0x370   :  { %v675_v18 = vpop.eup %674 }
 0x371   :  { %633 = vmatmul.mubr.msk.f32.vlgmr.msra.gmra.mrb[2].mxu0 %vm197_vm6, %v675_v18 }
 0x444   :  { %v552_v19 = vpop.f32.mrb[2].mxu0 }
 0x445   :  { %v553_v21 = vadd.f32 %v552_v19, %v482_v20  ;;  %v634_v22 = vpop.f32.mrb[3].mxu0 }
 0x447   :  { %676 = vtanh.f32 %v553_v21 }
 0x451   :  { %v677_v23 = vpop.eup %676 }
 0x452   :  { %557 = vst.msk [vmem:[%s809_s3] sm:$0xff] %vm197_vm6, %v677_v23 }
 0x453   :  { %562 = vsyncpa [#allocation3], 1 }

</bundles_post_ra>
